<compile_context>
chip_gen: v5e
topology: v5e:2x2
jax: 0.10.0
libtpu: 0.0.40
codegen_flags: <defaults>
</compile_context>

<pallas_src>
import jax
import jax.numpy as jnp
from jax import lax
from jax.experimental import pallas as pl
from jax.experimental.pallas import tpu as pltpu


# ------------------------------ fused kernel ---------------------------------
def make_rnn_embed_kernel(S, B, D_in, H, L, C):
    """All LSTM layers (wavefront-interleaved) + Linear + sigmoid, one call.

    Ref order: x_pad, w_in_wide, b_wide, w_rec, h0_cat, c0_cat, w_fc_pad, b_fc
               | out | gxb_scratch
    Lane layout of the G = 4*L*H gate axis: gate-grouped [i | f | g | o], each
    group L*H wide with layer l at lanes [l*H, (l+1)*H) inside its group.
    """
    G = 4 * L * H
    LH = L * H
    W = S + L - 1  # number of wavefront steps

    assert B % 8 == 0, "batch must be a multiple of 8 (sublane tiling)"
    assert (4 * H) % 128 == 0, "4*hidden must be a multiple of 128 (lane tiling)"
    assert S >= 1 and L >= 1

    def kernel(x_ref, win_ref, bw_ref, wrec_ref, h0_ref, c0_ref,
               wfc_ref, bfc_ref, out_ref, gxb_sc):
        # Hoisted layer-0 input projection for ALL (padded) timesteps: one big
        # MXU matmul; biases of every layer are pre-placed in b_wide so the
        # gxb row block for wave w already carries everything x-independent.
        gxb_sc[...] = jnp.dot(x_ref[...], win_ref[...],
                              preferred_element_type=jnp.float32) + bw_ref[...]

        # Hoisted lane masks: g-gate lanes get tanh, the rest sigmoid via
        # sigmoid(x) = 0.5*(tanh(x/2)+1)  -> single EUP pass per wave.
        lane = lax.broadcasted_iota(jnp.int32, (B, G), 1)
        is_g = (lane >= 2 * LH) & (lane < 3 * LH)
        scale = jnp.where(is_g, 1.0, 0.5).astype(jnp.float32)
        lane_s = lax.broadcasted_iota(jnp.int32, (B, LH), 1)

        wrec = wrec_ref[...]                 # (LH, G) bf16 fused recurrent W
        h_init = h0_ref[...]                 # (B, LH) f32
        c_init = c0_ref[...]
        h_cat = h_init
        c_cat = c_init

        # Fully unrolled wavefront (S, L static & small): layer l runs step
        # w-l at wave w; its x-input is layer l-1's h from the previous wave,
        # which already sits in h_cat -- so ONE fused matmul per wave.
        # TODO(synk): pltpu.matmul_push_rhs once + matmul_acc_lhs per wave.
        for w in range(W):
            g = gxb_sc[pl.ds(w * B, B), :] + jnp.dot(
                h_cat.astype(jnp.bfloat16), wrec,
                preferred_element_type=jnp.float32)          # (B, G) f32
            t = jnp.tanh(g * scale)                           # one EUP pass
            act = jnp.where(is_g, t, 0.5 * t + 0.5)
            i_cat = act[:, 0 * LH:1 * LH]
            f_cat = act[:, 1 * LH:2 * LH]
            g_cat = act[:, 2 * LH:3 * LH]
            o_cat = act[:, 3 * LH:4 * LH]
            c_new = f_cat * c_cat + i_cat * g_cat
            h_new = o_cat * jnp.tanh(c_new)
            if w < L - 1:
                # layers l > w have not started yet: keep their lanes at init
                started = lane_s < (w + 1) * H                # static mask
                c_cat = jnp.where(started, c_new, c_init)
                h_cat = jnp.where(started, h_new, h_init)
            else:
                c_cat = c_new
                h_cat = h_new

        # Fused FC head + sigmoid; w_fc is zero-padded so only the last
        # layer's lanes of h_cat contribute (stays lane-dense, no slice).
        logits = jnp.dot(h_cat, wfc_ref[...],
                         preferred_element_type=jnp.float32) + bfc_ref[...]
        out_ref[...] = jax.nn.sigmoid(logits)

    return kernel


# ------------------------------ wrapper ---------------------------------------
def rnn_embed_forward(packed, x, h0, c0, num_layers):
    """x: (B, S, input_size) batch-first, h0/c0: (L, B, H) -- as in PyTorch."""
    B, S, D = x.shape
    L = num_layers
    H = h0.shape[-1]
    C = packed["w_fc_pad"].shape[-1]
    G = 4 * L * H

    # time-major flatten + zero-pad L-1 wavefront-tail steps; bf16 MXU operand
    x_tm = jnp.transpose(x, (1, 0, 2)).reshape(S * B, D)
    x_pad = jnp.concatenate(
        [x_tm, jnp.zeros(((L - 1) * B, D), x.dtype)], axis=0).astype(jnp.bfloat16)

    # concatenate per-layer initial states along lanes -> (B, L*H)
    h0_cat = jnp.transpose(h0, (1, 0, 2)).reshape(B, L * H)
    c0_cat = jnp.transpose(c0, (1, 0, 2)).reshape(B, L * H)

    kernel = make_rnn_embed_kernel(S, B, D, H, L, C)
    vmem_spec = pl.BlockSpec(memory_space=pltpu.MemorySpace.VMEM)
    return pl.pallas_call(
        kernel,
        out_shape=jax.ShapeDtypeStruct((B, C), jnp.float32),
        in_specs=[vmem_spec] * 8,
        out_specs=vmem_spec,
        scratch_shapes=[pltpu.VMEM(((S + L - 1) * B, G), jnp.float32)],
    )(x_pad, packed["w_in_wide"], packed["b_wide"], packed["w_rec"],
      h0_cat, c0_cat, packed["w_fc_pad"], packed["b_fc"])


# ------------------------------ params ----------------------------------------
def init_params(key, input_size, hidden_size, num_layers, num_classes):
    """PyTorch-layout parameters, uniform(-1/sqrt(H), 1/sqrt(H))."""
    params = {}
    bound = 1.0 / float(hidden_size) ** 0.5
    keys = jax.random.split(key, num_layers * 4 + 2)
    k = 0
    for l in range(num_layers):
        d_in = input_size if l == 0 else hidden_size
        params[f"w_ih_{l}"] = jax.random.uniform(
            keys[k], (4 * hidden_size, d_in), jnp.float32, -bound, bound); k += 1
        params[f"w_hh_{l}"] = jax.random.uniform(
            keys[k], (4 * hidden_size, hidden_size), jnp.float32, -bound, bound); k += 1
        params[f"b_ih_{l}"] = jax.random.uniform(
            keys[k], (4 * hidden_size,), jnp.float32, -bound, bound); k += 1
        params[f"b_hh_{l}"] = jax.random.uniform(
            keys[k], (4 * hidden_size,), jnp.float32, -bound, bound); k += 1
    params["w_fc"] = jax.random.uniform(
        keys[k], (num_classes, hidden_size), jnp.float32, -bound, bound); k += 1
    params["b_fc"] = jax.random.uniform(
        keys[k], (num_classes,), jnp.float32, -bound, bound)
    return params


def pack_params(params, hidden_size, num_layers, num_classes):
    """One-time packing into the fused, gate-grouped kernel layout."""
    H, L, C = hidden_size, num_layers, num_classes
    G = 4 * L * H

    def place(w_t, l):
        # w_t: (K, 4H) in torch gate order [i|f|g|o]; scatter into gate-grouped
        # (K, 4, L, H) layout at layer slot l, flatten to (K, G).
        K = w_t.shape[0]
        wide = jnp.zeros((K, 4, L, H), w_t.dtype)
        wide = wide.at[:, :, l, :].set(w_t.reshape(K, 4, H))
        return wide.reshape(K, G)

    # layer-0 input projection (zeros in other layers' lanes)
    w_in_wide = place(params["w_ih_0"].T, 0).astype(jnp.bfloat16)      # (D, G)

    # all layers' combined biases, pre-placed
    b_wide = jnp.zeros((1, G), jnp.float32)
    for l in range(L):
        b_l = (params[f"b_ih_{l}"] + params[f"b_hh_{l}"]).reshape(1, 4 * H)
        b_wide = b_wide + place(b_l, l)

    # fused recurrent weight: row block l carries W_hh_l (its own gates) and
    # W_ih_{l+1} (next layer's input projection); zero elsewhere.
    w_rec = jnp.zeros((L * H, G), jnp.float32)
    for l in range(L):
        blk = place(params[f"w_hh_{l}"].T, l)                           # (H, G)
        if l + 1 < L:
            blk = blk + place(params[f"w_ih_{l + 1}"].T, l + 1)
        w_rec = w_rec.at[l * H:(l + 1) * H, :].set(blk)
    w_rec = w_rec.astype(jnp.bfloat16)

    # FC weight padded so it consumes the whole lane-dense h slab
    w_fc_pad = jnp.zeros((L * H, C), jnp.float32)
    w_fc_pad = w_fc_pad.at[(L - 1) * H:, :].set(params["w_fc"].T)
    b_fc = params["b_fc"].reshape(1, C)

    return dict(w_in_wide=w_in_wide, b_wide=b_wide, w_rec=w_rec,
                w_fc_pad=w_fc_pad, b_fc=b_fc)


# ------------------------ pure-JAX reference (same numerics) ------------------
def rnn_embed_reference(params, x, h0, c0, num_layers):
    B, S, _ = x.shape
    H = h0.shape[-1]
    seq = jnp.transpose(x, (1, 0, 2))                     # (S, B, D) f32
    h = None
    for l in range(num_layers):
        wih = params[f"w_ih_{l}"].T.astype(jnp.bfloat16)  # (D_in, 4H)
        whh = params[f"w_hh_{l}"].T.astype(jnp.bfloat16)  # (H, 4H)
        b = (params[f"b_ih_{l}"] + params[f"b_hh_{l}"]).reshape(1, 4 * H)
        d_in = wih.shape[0]
        gx = jnp.dot(seq.reshape(S * B, d_in).astype(jnp.bfloat16), wih,
                     preferred_element_type=jnp.float32) + b
        h = h0[l]; c = c0[l]
        outs = []
        for t in range(S):
            g = gx[t * B:(t + 1) * B] + jnp.dot(
                h.astype(jnp.bfloat16), whh, preferred_element_type=jnp.float32)
            i_g = jax.nn.sigmoid(g[:, 0 * H:1 * H])
            f_g = jax.nn.sigmoid(g[:, 1 * H:2 * H])
            g_g = jnp.tanh(g[:, 2 * H:3 * H])
            o_g = jax.nn.sigmoid(g[:, 3 * H:4 * H])
            c = f_g * c + i_g * g_g
            h = o_g * jnp.tanh(c)
            outs.append(h)
        seq = jnp.stack(outs, axis=0)
    logits = jnp.dot(h, params["w_fc"].T,
                     preferred_element_type=jnp.float32) + params["b_fc"].reshape(1, -1)
    return jax.nn.sigmoid(logits)


# --------------------------------- main ----------------------------------------
if __name__ == "__main__":
    B, S, INPUT, HIDDEN, LAYERS, CLASSES = 8, 8, 16, 32, 2, 4

    root = jax.random.PRNGKey(0)
    k_param, k_x, k_h0, k_c0 = jax.random.split(root, 4)

    params = init_params(k_param, INPUT, HIDDEN, LAYERS, CLASSES)
    packed = pack_params(params, HIDDEN, LAYERS, CLASSES)

    x = jax.random.normal(k_x, (B, S, INPUT), jnp.float32)
    h0 = jax.random.normal(k_h0, (LAYERS, B, HIDDEN), jnp.float32)
    c0 = jax.random.normal(k_c0, (LAYERS, B, HIDDEN), jnp.float32)

    fwd = jax.jit(rnn_embed_forward, static_argnames=("num_layers",))
    out = jax.block_until_ready(fwd(packed, x, h0, c0, num_layers=LAYERS))
    ref = jax.block_until_ready(rnn_embed_reference(params, x, h0, c0, LAYERS))

    assert out.shape == (B, CLASSES)
    assert bool(jnp.all((out >= 0.0) & (out <= 1.0)))
    max_err = float(jnp.max(jnp.abs(out - ref)))
    assert max_err < 2e-2, f"mismatch vs reference: {max_err}"
    print("KERNEL_OK")
</pallas_src>

<mosaic_0001>
module attributes {stable_mosaic.version = 11 : i64} {
  func.func @kernel(%arg0: memref<72x16xbf16, #tpu.memory_space<vmem>>, %arg1: memref<16x256xbf16, #tpu.memory_space<vmem>>, %arg2: memref<1x256xf32, #tpu.memory_space<vmem>>, %arg3: memref<64x256xbf16, #tpu.memory_space<vmem>>, %arg4: memref<8x64xf32, #tpu.memory_space<vmem>>, %arg5: memref<8x64xf32, #tpu.memory_space<vmem>>, %arg6: memref<64x4xf32, #tpu.memory_space<vmem>>, %arg7: memref<1x4xf32, #tpu.memory_space<vmem>>, %arg8: memref<8x4xf32, #tpu.memory_space<vmem>>, %arg9: memref<72x256xf32, #tpu.memory_space<vmem>>) attributes {dimension_semantics = [], scalar_prefetch = 0 : i64, scratch_operands = 1 : i64, tpu.core_type = #tpu.core_type<tc>} {
    %c0 = arith.constant 0 : index
    %c0_0 = arith.constant 0 : index
    %0 = vector.load %arg0[%c0, %c0_0] : memref<72x16xbf16, #tpu.memory_space<vmem>>, vector<72x16xbf16>
    %c0_1 = arith.constant 0 : index
    %c0_2 = arith.constant 0 : index
    %1 = vector.load %arg1[%c0_1, %c0_2] : memref<16x256xbf16, #tpu.memory_space<vmem>>, vector<16x256xbf16>
    %cst = arith.constant dense<0.000000e+00> : vector<72x256xf32>
    %2 = tpu.matmul %0, %1, %cst {dimension_numbers = #tpu.dot_dimension_numbers<[1], [0], [0], [1], [0, 0, 1, 1], [], []>} : vector<72x16xbf16>, vector<16x256xbf16>, vector<72x256xf32> -> vector<72x256xf32>
    %c0_3 = arith.constant 0 : index
    %c0_4 = arith.constant 0 : index
    %3 = vector.load %arg2[%c0_3, %c0_4] : memref<1x256xf32, #tpu.memory_space<vmem>>, vector<1x256xf32>
    %4 = vector.broadcast %3 : vector<1x256xf32> to vector<72x256xf32>
    %5 = arith.addf %2, %4 : vector<72x256xf32>
    %c0_5 = arith.constant 0 : index
    %c0_6 = arith.constant 0 : index
    %6 = vector.load %arg9[%c0_5, %c0_6] : memref<72x256xf32, #tpu.memory_space<vmem>>, vector<72x256xf32>
    tpu.vector_store %arg9[%c0_5, %c0_6], %5 {strides = array<i32>} : memref<72x256xf32, #tpu.memory_space<vmem>>, vector<72x256xf32>,
    %7 = tpu.iota {dimensions = array<i32: 1>} : vector<8x256xi32>
    %c128_i32 = arith.constant 128 : i32
    %8 = vector.broadcast %c128_i32 : i32 to vector<8x256xi32>
    %9 = arith.cmpi sge, %7, %8 : vector<8x256xi32>
    %c192_i32 = arith.constant 192 : i32
    %10 = vector.broadcast %c192_i32 : i32 to vector<8x256xi32>
    %11 = arith.cmpi slt, %7, %10 : vector<8x256xi32>
    %12 = arith.andi %9, %11 : vector<8x256xi1>
    %cst_7 = arith.constant 1.000000e+00 : f32
    %cst_8 = arith.constant 5.000000e-01 : f32
    %13 = vector.broadcast %cst_7 : f32 to vector<8x256xf32>
    %14 = vector.broadcast %cst_8 : f32 to vector<8x256xf32>
    %15 = arith.select %12, %13, %14 : vector<8x256xi1>, vector<8x256xf32>
    %16 = tpu.iota {dimensions = array<i32: 1>} : vector<8x64xi32>
    %c0_9 = arith.constant 0 : index
    %c0_10 = arith.constant 0 : index
    %17 = vector.load %arg3[%c0_9, %c0_10] : memref<64x256xbf16, #tpu.memory_space<vmem>>, vector<64x256xbf16>
    %c0_11 = arith.constant 0 : index
    %c0_12 = arith.constant 0 : index
    %18 = vector.load %arg4[%c0_11, %c0_12] : memref<8x64xf32, #tpu.memory_space<vmem>>, vector<8x64xf32>
    %c0_13 = arith.constant 0 : index
    %c0_14 = arith.constant 0 : index
    %19 = vector.load %arg5[%c0_13, %c0_14] : memref<8x64xf32, #tpu.memory_space<vmem>>, vector<8x64xf32>
    %c0_15 = arith.constant 0 : index
    %c0_16 = arith.constant 0 : index
    %20 = vector.load %arg9[%c0_15, %c0_16] : memref<72x256xf32, #tpu.memory_space<vmem>>, vector<8x256xf32>
    %21 = arith.truncf %18 : vector<8x64xf32> to vector<8x64xbf16>
    %cst_17 = arith.constant dense<0.000000e+00> : vector<8x256xf32>
    %22 = tpu.matmul %21, %17, %cst_17 {dimension_numbers = #tpu.dot_dimension_numbers<[1], [0], [0], [1], [0, 0, 1, 1], [], []>} : vector<8x64xbf16>, vector<64x256xbf16>, vector<8x256xf32> -> vector<8x256xf32>
    %23 = arith.addf %20, %22 : vector<8x256xf32>
    %24 = arith.mulf %23, %15 : vector<8x256xf32>
    %25 = math.tanh %24 : vector<8x256xf32>
    %cst_18 = arith.constant 5.000000e-01 : f32
    %26 = vector.broadcast %cst_18 : f32 to vector<8x256xf32>
    %27 = arith.mulf %26, %25 : vector<8x256xf32>
    %cst_19 = arith.constant 5.000000e-01 : f32
    %28 = vector.broadcast %cst_19 : f32 to vector<8x256xf32>
    %29 = arith.addf %27, %28 : vector<8x256xf32>
    %30 = arith.select %12, %25, %29 : vector<8x256xi1>, vector<8x256xf32>
    %31 = vector.extract_strided_slice %30 {offsets = [0, 0], sizes = [8, 64], strides = [1, 1]} : vector<8x256xf32> to vector<8x64xf32>
    %32 = vector.extract_strided_slice %30 {offsets = [0, 64], sizes = [8, 64], strides = [1, 1]} : vector<8x256xf32> to vector<8x64xf32>
    %33 = vector.extract_strided_slice %30 {offsets = [0, 128], sizes = [8, 64], strides = [1, 1]} : vector<8x256xf32> to vector<8x64xf32>
    %34 = vector.extract_strided_slice %30 {offsets = [0, 192], sizes = [8, 64], strides = [1, 1]} : vector<8x256xf32> to vector<8x64xf32>
    %35 = arith.mulf %32, %19 : vector<8x64xf32>
    %36 = arith.mulf %31, %33 : vector<8x64xf32>
    %37 = arith.addf %35, %36 : vector<8x64xf32>
    %38 = math.tanh %37 : vector<8x64xf32>
    %39 = arith.mulf %34, %38 : vector<8x64xf32>
    %c32_i32 = arith.constant 32 : i32
    %40 = vector.broadcast %c32_i32 : i32 to vector<8x64xi32>
    %41 = arith.cmpi slt, %16, %40 : vector<8x64xi32>
    %42 = arith.select %41, %37, %19 : vector<8x64xi1>, vector<8x64xf32>
    %43 = arith.select %41, %39, %18 : vector<8x64xi1>, vector<8x64xf32>
    %c8 = arith.constant 8 : index
    %c0_20 = arith.constant 0 : index
    %44 = vector.load %arg9[%c8, %c0_20] : memref<72x256xf32, #tpu.memory_space<vmem>>, vector<8x256xf32>
    %45 = arith.truncf %43 : vector<8x64xf32> to vector<8x64xbf16>
    %cst_21 = arith.constant dense<0.000000e+00> : vector<8x256xf32>
    %46 = tpu.matmul %45, %17, %cst_21 {dimension_numbers = #tpu.dot_dimension_numbers<[1], [0], [0], [1], [0, 0, 1, 1], [], []>} : vector<8x64xbf16>, vector<64x256xbf16>, vector<8x256xf32> -> vector<8x256xf32>
    %47 = arith.addf %44, %46 : vector<8x256xf32>
    %48 = arith.mulf %47, %15 : vector<8x256xf32>
    %49 = math.tanh %48 : vector<8x256xf32>
    %cst_22 = arith.constant 5.000000e-01 : f32
    %50 = vector.broadcast %cst_22 : f32 to vector<8x256xf32>
    %51 = arith.mulf %50, %49 : vector<8x256xf32>
    %cst_23 = arith.constant 5.000000e-01 : f32
    %52 = vector.broadcast %cst_23 : f32 to vector<8x256xf32>
    %53 = arith.addf %51, %52 : vector<8x256xf32>
    %54 = arith.select %12, %49, %53 : vector<8x256xi1>, vector<8x256xf32>
    %55 = vector.extract_strided_slice %54 {offsets = [0, 0], sizes = [8, 64], strides = [1, 1]} : vector<8x256xf32> to vector<8x64xf32>
    %56 = vector.extract_strided_slice %54 {offsets = [0, 64], sizes = [8, 64], strides = [1, 1]} : vector<8x256xf32> to vector<8x64xf32>
    %57 = vector.extract_strided_slice %54 {offsets = [0, 128], sizes = [8, 64], strides = [1, 1]} : vector<8x256xf32> to vector<8x64xf32>
    %58 = vector.extract_strided_slice %54 {offsets = [0, 192], sizes = [8, 64], strides = [1, 1]} : vector<8x256xf32> to vector<8x64xf32>
    %59 = arith.mulf %56, %42 : vector<8x64xf32>
    %60 = arith.mulf %55, %57 : vector<8x64xf32>
    %61 = arith.addf %59, %60 : vector<8x64xf32>
    %62 = math.tanh %61 : vector<8x64xf32>
    %63 = arith.mulf %58, %62 : vector<8x64xf32>
    %c16 = arith.constant 16 : index
    %c0_24 = arith.constant 0 : index
    %64 = vector.load %arg9[%c16, %c0_24] : memref<72x256xf32, #tpu.memory_space<vmem>>, vector<8x256xf32>
    %65 = arith.truncf %63 : vector<8x64xf32> to vector<8x64xbf16>
    %cst_25 = arith.constant dense<0.000000e+00> : vector<8x256xf32>
    %66 = tpu.matmul %65, %17, %cst_25 {dimension_numbers = #tpu.dot_dimension_numbers<[1], [0], [0], [1], [0, 0, 1, 1], [], []>} : vector<8x64xbf16>, vector<64x256xbf16>, vector<8x256xf32> -> vector<8x256xf32>
    %67 = arith.addf %64, %66 : vector<8x256xf32>
    %68 = arith.mulf %67, %15 : vector<8x256xf32>
    %69 = math.tanh %68 : vector<8x256xf32>
    %cst_26 = arith.constant 5.000000e-01 : f32
    %70 = vector.broadcast %cst_26 : f32 to vector<8x256xf32>
    %71 = arith.mulf %70, %69 : vector<8x256xf32>
    %cst_27 = arith.constant 5.000000e-01 : f32
    %72 = vector.broadcast %cst_27 : f32 to vector<8x256xf32>
    %73 = arith.addf %71, %72 : vector<8x256xf32>
    %74 = arith.select %12, %69, %73 : vector<8x256xi1>, vector<8x256xf32>
    %75 = vector.extract_strided_slice %74 {offsets = [0, 0], sizes = [8, 64], strides = [1, 1]} : vector<8x256xf32> to vector<8x64xf32>
    %76 = vector.extract_strided_slice %74 {offsets = [0, 64], sizes = [8, 64], strides = [1, 1]} : vector<8x256xf32> to vector<8x64xf32>
    %77 = vector.extract_strided_slice %74 {offsets = [0, 128], sizes = [8, 64], strides = [1, 1]} : vector<8x256xf32> to vector<8x64xf32>
    %78 = vector.extract_strided_slice %74 {offsets = [0, 192], sizes = [8, 64], strides = [1, 1]} : vector<8x256xf32> to vector<8x64xf32>
    %79 = arith.mulf %76, %61 : vector<8x64xf32>
    %80 = arith.mulf %75, %77 : vector<8x64xf32>
    %81 = arith.addf %79, %80 : vector<8x64xf32>
    %82 = math.tanh %81 : vector<8x64xf32>
    %83 = arith.mulf %78, %82 : vector<8x64xf32>
    %c24 = arith.constant 24 : index
    %c0_28 = arith.constant 0 : index
    %84 = vector.load %arg9[%c24, %c0_28] : memref<72x256xf32, #tpu.memory_space<vmem>>, vector<8x256xf32>
    %85 = arith.truncf %83 : vector<8x64xf32> to vector<8x64xbf16>
    %cst_29 = arith.constant dense<0.000000e+00> : vector<8x256xf32>
    %86 = tpu.matmul %85, %17, %cst_29 {dimension_numbers = #tpu.dot_dimension_numbers<[1], [0], [0], [1], [0, 0, 1, 1], [], []>} : vector<8x64xbf16>, vector<64x256xbf16>, vector<8x256xf32> -> vector<8x256xf32>
    %87 = arith.addf %84, %86 : vector<8x256xf32>
    %88 = arith.mulf %87, %15 : vector<8x256xf32>
    %89 = math.tanh %88 : vector<8x256xf32>
    %cst_30 = arith.constant 5.000000e-01 : f32
    %90 = vector.broadcast %cst_30 : f32 to vector<8x256xf32>
    %91 = arith.mulf %90, %89 : vector<8x256xf32>
    %cst_31 = arith.constant 5.000000e-01 : f32
    %92 = vector.broadcast %cst_31 : f32 to vector<8x256xf32>
    %93 = arith.addf %91, %92 : vector<8x256xf32>
    %94 = arith.select %12, %89, %93 : vector<8x256xi1>, vector<8x256xf32>
    %95 = vector.extract_strided_slice %94 {offsets = [0, 0], sizes = [8, 64], strides = [1, 1]} : vector<8x256xf32> to vector<8x64xf32>
    %96 = vector.extract_strided_slice %94 {offsets = [0, 64], sizes = [8, 64], strides = [1, 1]} : vector<8x256xf32> to vector<8x64xf32>
    %97 = vector.extract_strided_slice %94 {offsets = [0, 128], sizes = [8, 64], strides = [1, 1]} : vector<8x256xf32> to vector<8x64xf32>
    %98 = vector.extract_strided_slice %94 {offsets = [0, 192], sizes = [8, 64], strides = [1, 1]} : vector<8x256xf32> to vector<8x64xf32>
    %99 = arith.mulf %96, %81 : vector<8x64xf32>
    %100 = arith.mulf %95, %97 : vector<8x64xf32>
    %101 = arith.addf %99, %100 : vector<8x64xf32>
    %102 = math.tanh %101 : vector<8x64xf32>
    %103 = arith.mulf %98, %102 : vector<8x64xf32>
    %c32 = arith.constant 32 : index
    %c0_32 = arith.constant 0 : index
    %104 = vector.load %arg9[%c32, %c0_32] : memref<72x256xf32, #tpu.memory_space<vmem>>, vector<8x256xf32>
    %105 = arith.truncf %103 : vector<8x64xf32> to vector<8x64xbf16>
    %cst_33 = arith.constant dense<0.000000e+00> : vector<8x256xf32>
    %106 = tpu.matmul %105, %17, %cst_33 {dimension_numbers = #tpu.dot_dimension_numbers<[1], [0], [0], [1], [0, 0, 1, 1], [], []>} : vector<8x64xbf16>, vector<64x256xbf16>, vector<8x256xf32> -> vector<8x256xf32>
    %107 = arith.addf %104, %106 : vector<8x256xf32>
    %108 = arith.mulf %107, %15 : vector<8x256xf32>
    %109 = math.tanh %108 : vector<8x256xf32>
    %cst_34 = arith.constant 5.000000e-01 : f32
    %110 = vector.broadcast %cst_34 : f32 to vector<8x256xf32>
    %111 = arith.mulf %110, %109 : vector<8x256xf32>
    %cst_35 = arith.constant 5.000000e-01 : f32
    %112 = vector.broadcast %cst_35 : f32 to vector<8x256xf32>
    %113 = arith.addf %111, %112 : vector<8x256xf32>
    %114 = arith.select %12, %109, %113 : vector<8x256xi1>, vector<8x256xf32>
    %115 = vector.extract_strided_slice %114 {offsets = [0, 0], sizes = [8, 64], strides = [1, 1]} : vector<8x256xf32> to vector<8x64xf32>
    %116 = vector.extract_strided_slice %114 {offsets = [0, 64], sizes = [8, 64], strides = [1, 1]} : vector<8x256xf32> to vector<8x64xf32>
    %117 = vector.extract_strided_slice %114 {offsets = [0, 128], sizes = [8, 64], strides = [1, 1]} : vector<8x256xf32> to vector<8x64xf32>
    %118 = vector.extract_strided_slice %114 {offsets = [0, 192], sizes = [8, 64], strides = [1, 1]} : vector<8x256xf32> to vector<8x64xf32>
    %119 = arith.mulf %116, %101 : vector<8x64xf32>
    %120 = arith.mulf %115, %117 : vector<8x64xf32>
    %121 = arith.addf %119, %120 : vector<8x64xf32>
    %122 = math.tanh %121 : vector<8x64xf32>
    %123 = arith.mulf %118, %122 : vector<8x64xf32>
    %c40 = arith.constant 40 : index
    %c0_36 = arith.constant 0 : index
    %124 = vector.load %arg9[%c40, %c0_36] : memref<72x256xf32, #tpu.memory_space<vmem>>, vector<8x256xf32>
    %125 = arith.truncf %123 : vector<8x64xf32> to vector<8x64xbf16>
    %cst_37 = arith.constant dense<0.000000e+00> : vector<8x256xf32>
    %126 = tpu.matmul %125, %17, %cst_37 {dimension_numbers = #tpu.dot_dimension_numbers<[1], [0], [0], [1], [0, 0, 1, 1], [], []>} : vector<8x64xbf16>, vector<64x256xbf16>, vector<8x256xf32> -> vector<8x256xf32>
    %127 = arith.addf %124, %126 : vector<8x256xf32>
    %128 = arith.mulf %127, %15 : vector<8x256xf32>
    %129 = math.tanh %128 : vector<8x256xf32>
    %cst_38 = arith.constant 5.000000e-01 : f32
    %130 = vector.broadcast %cst_38 : f32 to vector<8x256xf32>
    %131 = arith.mulf %130, %129 : vector<8x256xf32>
    %cst_39 = arith.constant 5.000000e-01 : f32
    %132 = vector.broadcast %cst_39 : f32 to vector<8x256xf32>
    %133 = arith.addf %131, %132 : vector<8x256xf32>
    %134 = arith.select %12, %129, %133 : vector<8x256xi1>, vector<8x256xf32>
    %135 = vector.extract_strided_slice %134 {offsets = [0, 0], sizes = [8, 64], strides = [1, 1]} : vector<8x256xf32> to vector<8x64xf32>
    %136 = vector.extract_strided_slice %134 {offsets = [0, 64], sizes = [8, 64], strides = [1, 1]} : vector<8x256xf32> to vector<8x64xf32>
    %137 = vector.extract_strided_slice %134 {offsets = [0, 128], sizes = [8, 64], strides = [1, 1]} : vector<8x256xf32> to vector<8x64xf32>
    %138 = vector.extract_strided_slice %134 {offsets = [0, 192], sizes = [8, 64], strides = [1, 1]} : vector<8x256xf32> to vector<8x64xf32>
    %139 = arith.mulf %136, %121 : vector<8x64xf32>
    %140 = arith.mulf %135, %137 : vector<8x64xf32>
    %141 = arith.addf %139, %140 : vector<8x64xf32>
    %142 = math.tanh %141 : vector<8x64xf32>
    %143 = arith.mulf %138, %142 : vector<8x64xf32>
    %c48 = arith.constant 48 : index
    %c0_40 = arith.constant 0 : index
    %144 = vector.load %arg9[%c48, %c0_40] : memref<72x256xf32, #tpu.memory_space<vmem>>, vector<8x256xf32>
    %145 = arith.truncf %143 : vector<8x64xf32> to vector<8x64xbf16>
    %cst_41 = arith.constant dense<0.000000e+00> : vector<8x256xf32>
    %146 = tpu.matmul %145, %17, %cst_41 {dimension_numbers = #tpu.dot_dimension_numbers<[1], [0], [0], [1], [0, 0, 1, 1], [], []>} : vector<8x64xbf16>, vector<64x256xbf16>, vector<8x256xf32> -> vector<8x256xf32>
    %147 = arith.addf %144, %146 : vector<8x256xf32>
    %148 = arith.mulf %147, %15 : vector<8x256xf32>
    %149 = math.tanh %148 : vector<8x256xf32>
    %cst_42 = arith.constant 5.000000e-01 : f32
    %150 = vector.broadcast %cst_42 : f32 to vector<8x256xf32>
    %151 = arith.mulf %150, %149 : vector<8x256xf32>
    %cst_43 = arith.constant 5.000000e-01 : f32
    %152 = vector.broadcast %cst_43 : f32 to vector<8x256xf32>
    %153 = arith.addf %151, %152 : vector<8x256xf32>
    %154 = arith.select %12, %149, %153 : vector<8x256xi1>, vector<8x256xf32>
    %155 = vector.extract_strided_slice %154 {offsets = [0, 0], sizes = [8, 64], strides = [1, 1]} : vector<8x256xf32> to vector<8x64xf32>
    %156 = vector.extract_strided_slice %154 {offsets = [0, 64], sizes = [8, 64], strides = [1, 1]} : vector<8x256xf32> to vector<8x64xf32>
    %157 = vector.extract_strided_slice %154 {offsets = [0, 128], sizes = [8, 64], strides = [1, 1]} : vector<8x256xf32> to vector<8x64xf32>
    %158 = vector.extract_strided_slice %154 {offsets = [0, 192], sizes = [8, 64], strides = [1, 1]} : vector<8x256xf32> to vector<8x64xf32>
    %159 = arith.mulf %156, %141 : vector<8x64xf32>
    %160 = arith.mulf %155, %157 : vector<8x64xf32>
    %161 = arith.addf %159, %160 : vector<8x64xf32>
    %162 = math.tanh %161 : vector<8x64xf32>
    %163 = arith.mulf %158, %162 : vector<8x64xf32>
    %c56 = arith.constant 56 : index
    %c0_44 = arith.constant 0 : index
    %164 = vector.load %arg9[%c56, %c0_44] : memref<72x256xf32, #tpu.memory_space<vmem>>, vector<8x256xf32>
    %165 = arith.truncf %163 : vector<8x64xf32> to vector<8x64xbf16>
    %cst_45 = arith.constant dense<0.000000e+00> : vector<8x256xf32>
    %166 = tpu.matmul %165, %17, %cst_45 {dimension_numbers = #tpu.dot_dimension_numbers<[1], [0], [0], [1], [0, 0, 1, 1], [], []>} : vector<8x64xbf16>, vector<64x256xbf16>, vector<8x256xf32> -> vector<8x256xf32>
    %167 = arith.addf %164, %166 : vector<8x256xf32>
    %168 = arith.mulf %167, %15 : vector<8x256xf32>
    %169 = math.tanh %168 : vector<8x256xf32>
    %cst_46 = arith.constant 5.000000e-01 : f32
    %170 = vector.broadcast %cst_46 : f32 to vector<8x256xf32>
    %171 = arith.mulf %170, %169 : vector<8x256xf32>
    %cst_47 = arith.constant 5.000000e-01 : f32
    %172 = vector.broadcast %cst_47 : f32 to vector<8x256xf32>
    %173 = arith.addf %171, %172 : vector<8x256xf32>
    %174 = arith.select %12, %169, %173 : vector<8x256xi1>, vector<8x256xf32>
    %175 = vector.extract_strided_slice %174 {offsets = [0, 0], sizes = [8, 64], strides = [1, 1]} : vector<8x256xf32> to vector<8x64xf32>
    %176 = vector.extract_strided_slice %174 {offsets = [0, 64], sizes = [8, 64], strides = [1, 1]} : vector<8x256xf32> to vector<8x64xf32>
    %177 = vector.extract_strided_slice %174 {offsets = [0, 128], sizes = [8, 64], strides = [1, 1]} : vector<8x256xf32> to vector<8x64xf32>
    %178 = vector.extract_strided_slice %174 {offsets = [0, 192], sizes = [8, 64], strides = [1, 1]} : vector<8x256xf32> to vector<8x64xf32>
    %179 = arith.mulf %176, %161 : vector<8x64xf32>
    %180 = arith.mulf %175, %177 : vector<8x64xf32>
    %181 = arith.addf %179, %180 : vector<8x64xf32>
    %182 = math.tanh %181 : vector<8x64xf32>
    %183 = arith.mulf %178, %182 : vector<8x64xf32>
    %c64 = arith.constant 64 : index
    %c0_48 = arith.constant 0 : index
    %184 = vector.load %arg9[%c64, %c0_48] : memref<72x256xf32, #tpu.memory_space<vmem>>, vector<8x256xf32>
    %185 = arith.truncf %183 : vector<8x64xf32> to vector<8x64xbf16>
    %cst_49 = arith.constant dense<0.000000e+00> : vector<8x256xf32>
    %186 = tpu.matmul %185, %17, %cst_49 {dimension_numbers = #tpu.dot_dimension_numbers<[1], [0], [0], [1], [0, 0, 1, 1], [], []>} : vector<8x64xbf16>, vector<64x256xbf16>, vector<8x256xf32> -> vector<8x256xf32>
    %187 = arith.addf %184, %186 : vector<8x256xf32>
    %188 = arith.mulf %187, %15 : vector<8x256xf32>
    %189 = math.tanh %188 : vector<8x256xf32>
    %cst_50 = arith.constant 5.000000e-01 : f32
    %190 = vector.broadcast %cst_50 : f32 to vector<8x256xf32>
    %191 = arith.mulf %190, %189 : vector<8x256xf32>
    %cst_51 = arith.constant 5.000000e-01 : f32
    %192 = vector.broadcast %cst_51 : f32 to vector<8x256xf32>
    %193 = arith.addf %191, %192 : vector<8x256xf32>
    %194 = arith.select %12, %189, %193 : vector<8x256xi1>, vector<8x256xf32>
    %195 = vector.extract_strided_slice %194 {offsets = [0, 0], sizes = [8, 64], strides = [1, 1]} : vector<8x256xf32> to vector<8x64xf32>
    %196 = vector.extract_strided_slice %194 {offsets = [0, 64], sizes = [8, 64], strides = [1, 1]} : vector<8x256xf32> to vector<8x64xf32>
    %197 = vector.extract_strided_slice %194 {offsets = [0, 128], sizes = [8, 64], strides = [1, 1]} : vector<8x256xf32> to vector<8x64xf32>
    %198 = vector.extract_strided_slice %194 {offsets = [0, 192], sizes = [8, 64], strides = [1, 1]} : vector<8x256xf32> to vector<8x64xf32>
    %199 = arith.mulf %196, %181 : vector<8x64xf32>
    %200 = arith.mulf %195, %197 : vector<8x64xf32>
    %201 = arith.addf %199, %200 : vector<8x64xf32>
    %202 = math.tanh %201 : vector<8x64xf32>
    %203 = arith.mulf %198, %202 : vector<8x64xf32>
    %c0_52 = arith.constant 0 : index
    %c0_53 = arith.constant 0 : index
    %204 = vector.load %arg6[%c0_52, %c0_53] : memref<64x4xf32, #tpu.memory_space<vmem>>, vector<64x4xf32>
    %cst_54 = arith.constant dense<0.000000e+00> : vector<8x4xf32>
    %205 = tpu.matmul %203, %204, %cst_54 {dimension_numbers = #tpu.dot_dimension_numbers<[1], [0], [0], [1], [0, 0, 1, 1], [], []>} : vector<8x64xf32>, vector<64x4xf32>, vector<8x4xf32> -> vector<8x4xf32>
    %c0_55 = arith.constant 0 : index
    %c0_56 = arith.constant 0 : index
    %206 = vector.load %arg7[%c0_55, %c0_56] : memref<1x4xf32, #tpu.memory_space<vmem>>, vector<1x4xf32>
    %207 = vector.broadcast %206 : vector<1x4xf32> to vector<8x4xf32>
    %208 = arith.addf %205, %207 : vector<8x4xf32>
    %209 = arith.negf %208 : vector<8x4xf32>
    %210 = math.exp %209 : vector<8x4xf32>
    %cst_57 = arith.constant 1.000000e+00 : f32
    %211 = vector.broadcast %cst_57 : f32 to vector<8x4xf32>
    %212 = arith.addf %211, %210 : vector<8x4xf32>
    %213 = arith.divf %211, %212 : vector<8x4xf32>
    %c0_58 = arith.constant 0 : index
    %c0_59 = arith.constant 0 : index
    %214 = vector.load %arg8[%c0_58, %c0_59] : memref<8x4xf32, #tpu.memory_space<vmem>>, vector<8x4xf32>
    tpu.vector_store %arg8[%c0_58, %c0_59], %213 {strides = array<i32>} : memref<8x4xf32, #tpu.memory_space<vmem>>, vector<8x4xf32>,
    return
  }
}

</mosaic_0001>

<bundles_post_ra>
// kernel: rnn_embed_forward.1
= control target key start
LH: loop header
LB: loop body
LE: loop exit
PB: predicated region body
PF: predicated region fallthrough
CT: control target
= control target key end

     0   :  { %vm80_vm0 = vcmask 130048   ;;  %s982_s25 = smov 64   ;;  %vm244_vm1 = vcmask 523264   ;;  %v180_v34 = vlaneseq  ;;  %v983_v46 = vmov 0.5   ;;  %s1358_s3 = inlined_call_operand.vmem [shape: bf16[64,256], index: 3, kind: input, shape index: {}]   ;;  %s1359_s1 = inlined_call_operand.vmem [shape: bf16[16,256], index: 1, kind: input, shape index: {}]   ;;  %s1360_s0 = inlined_call_operand.vmem [shape: bf16[72,16], index: 0, kind: input, shape index: {}]   ;;  %s1361_s5 = inlined_call_operand.vmem [shape: f32[8,64], index: 5, kind: input, shape index: {}]   ;;  %s1362_s4 = inlined_call_operand.vmem [shape: f32[8,64], index: 4, kind: input, shape index: {}]   ;;  %s1363_s2 = inlined_call_operand.vmem [shape: f32[1,256], index: 2, kind: input, shape index: {}]   ;;  %s1364_s7 = inlined_call_operand.vmem [shape: f32[1,4], index: 7, kind: input, shape index: {}]   ;;  %s1365_s6 = inlined_call_operand.vmem [shape: f32[64,4], index: 6, kind: input, shape index: {}]   ;;  %s1366_s8 = inlined_call_operand.vmem [shape: f32[8,4], index: 8, kind: output, shape index: {}]  }
   0x1   :  { %v881_v0 = vld [vmem:[%s1358_s3 + $0x30] sm:$0xf]  ;;  %v920_v1 = vld [vmem:[%s1358_s3 + $0x34] sm:$0xf0]  ;;  %v919_v2 = vld [vmem:[%s1358_s3 + $0x34] sm:$0xf] }
   0x2   :  { %v1038_v3 = vor.u32 %v920_v1, %v881_v0  ;;  %v883_v4 = vld [vmem:[%s1358_s3 + $0x38] sm:$0xf0]  ;;  %v873_v5 = vld [vmem:[%s1358_s3 + $0x20] sm:$0xf]  ;;  %v918_v6 = vld [vmem:[%s1358_s3 + $0x24] sm:$0xf0] }
   0x3   :  { %v1049_v7 = vor.u32 %v919_v2, %v883_v4  ;;  %v917_v8 = vld [vmem:[%s1358_s3 + $0x24] sm:$0xf]  ;;  %v875_v9 = vld [vmem:[%s1358_s3 + $0x28] sm:$0xf0]  ;;  %v1061_v11 = vor.u32 %v918_v6, %v873_v5  ;;  %v865_v13 = vld [vmem:[%s1358_s3 + $0x10] sm:$0xf] }
   0x4   :  { %v911_v10 = vld [vmem:[%s1359_s1 + $0x4] sm:$0xf]  ;;  %252 = vmatpush.bf16.msra.mxu2 %v1038_v3  ;;  %v841_v12 = vld [vmem:[%s1359_s1 + $0x8] sm:$0xf0]  ;;  %v1070_v14 = vor.u32 %v917_v8, %v875_v9  ;;  %v916_v16 = vld [vmem:[%s1358_s3 + $0x14] sm:$0xf0] }
   0x5   :  { %265 = vmatpush.bf16.msra.mxu3 %v1049_v7  ;;  %v844_v15 = vor.u32 %v911_v10, %v841_v12  ;;  %v915_v17 = vld [vmem:[%s1358_s3 + $0x14] sm:$0xf]  ;;  %v839_v18 = vld [vmem:[%s1359_s1] sm:$0xf]  ;;  %v867_v19 = vld [vmem:[%s1358_s3 + $0x18] sm:$0xf0]  ;;  %v1091_v23 = vor.u32 %v916_v16, %v865_v13 }
   0x6   :  { %v912_v20 = vld [vmem:[%s1359_s1 + $0x4] sm:$0xf0]  ;;  %v907_v21 = vld [vmem:[%s1360_s0] sm:$0xff]  ;;  %v1100_v25 = vor.u32 %v915_v17, %v867_v19  ;;  %v859_v29 = vld [vmem:[%s1358_s3 + $0x8] sm:$0xf0]  ;;  %v181_v36 = vand.u32 127, %v180_v34 }
   0x7   :  { %136 = vmatpush.bf16.msra.mxu1 %v844_v15  ;;  %v840_v22 = vor.u32 %v912_v20, %v839_v18  ;;  %v1096_v24 = vld [vmem:[%s1361_s5] sm:$0xff]  ;;  %v914_v27 = vld [vmem:[%s1358_s3 + $0x4] sm:$0xf0]  ;;  %vm815_vm7 = vcmask 31744  }
   0x8   :  { %253 = vmatpush.bf16.msra.mxu2 %v1061_v11  ;;  %v857_v26 = vld [vmem:[%s1358_s3] sm:$0xf]  ;;  %v913_v28 = vld [vmem:[%s1358_s3 + $0x4] sm:$0xf]  ;;  %287 = vrot.lane.b32.xlu0 %v1096_v24, %s982_s25  ;;  %v1173_v39 = vadd.s32 128, %v181_v36  ;;  %vm299_vm3 = vcmp.lt.s32.totalorder %v181_v36, 32 }
   0x9   :  { %266 = vmatpush.bf16.msra.mxu3 %v1070_v14  ;;  %103 = vmatpush.bf16.msra.mxu0 %v840_v22  ;;  %v1120_v30 = vor.u32 %v914_v27, %v857_v26  ;;  %v1125_v31 = vld [vmem:[%s1362_s4] sm:$0xff]  ;;  %v1128_v32 = vor.u32 %v913_v28, %v859_v29 }
   0xa   :  { %850 = vmatmul.msk.bf16.vlgmr.msra.gmra.mxu1 %vm80_vm0, %v907_v21  ;;  %v203_v33 = vpack.c.bf16 %v1125_v31, %v1125_v31  ;;  %v41_v35 = vld [vmem:[%s1363_s2] sm:$0x3]  ;;  %vm186_vm2 = vcmp.lt.s32.totalorder %v1173_v39, 192 }
   0xb   :  { %561 = vmatpush.bf16.msrb.mxu1 %v1049_v7  ;;  %v1169_v37 = vperm.slane %v41_v35, 0  ;;  %v1171_v38 = vperm.slane %v41_v35, 1  ;;  %v1180_v47 = vsel %vm186_vm2, 1.0, %v983_v46  ;;  %v763_v39 = vld [vmem:[%s1365_s6 + $0x20] sm:$0xff] }
   0xc   :  { %254 = vmatpush.bf16.msra.mxu2 %v1091_v23  ;;  %845 = vmatmul.msk.bf16.vlgmr.msra.gmra.mxu0 %vm80_vm0, %v907_v21 }
   0xd   :  { %548 = vmatpush.bf16.msrb.mxu0 %v1038_v3  ;;  %267 = vmatpush.bf16.msra.mxu3 %v1100_v25 }
   0xf   :  { %562 = vmatpush.bf16.msrb.mxu1 %v1070_v14 }
  0x10   :  { %255 = vmatpush.bf16.msra.mxu2 %v1120_v30 }
  0x11   :  { %549 = vmatpush.bf16.msrb.mxu0 %v1061_v11  ;;  %268 = vmatpush.bf16.msra.mxu3 %v1128_v32 }
  0x13   :  { %563 = vmatpush.bf16.msrb.mxu1 %v1100_v25  ;;  %887 = vmatmul.msk.bf16.vlgmr.msra.gmra.mxu2 %vm244_vm1, %v203_v33 }
  0x14   :  { %320 = vmatpush.bf16.msrb.mxu2 %v1038_v3  ;;  %888 = vmatmul.msk.bf16.vlgmr.msra.gmra.mxu3 %vm244_vm1, %v203_v33 }
  0x15   :  { %333 = vmatpush.bf16.msrb.mxu3 %v1049_v7  ;;  %550 = vmatpush.bf16.msrb.mxu0 %v1091_v23 }
  0x17   :  { %564 = vmatpush.bf16.msrb.mxu1 %v1128_v32 }
  0x18   :  { %321 = vmatpush.bf16.msrb.mxu2 %v1061_v11 }
  0x19   :  { %334 = vmatpush.bf16.msrb.mxu3 %v1070_v14  ;;  %551 = vmatpush.bf16.msrb.mxu0 %v1120_v30 }
  0x1b   :  { %673 = vmatpush.bf16.msra.mxu1 %v1049_v7 }
  0x1c   :  { %322 = vmatpush.bf16.msrb.mxu2 %v1091_v23 }
  0x1d   :  { %660 = vmatpush.bf16.msra.mxu0 %v1038_v3  ;;  %335 = vmatpush.bf16.msrb.mxu3 %v1100_v25 }
  0x1f   :  { %674 = vmatpush.bf16.msra.mxu1 %v1070_v14 }
  0x20   :  { %323 = vmatpush.bf16.msrb.mxu2 %v1120_v30 }
  0x21   :  { %661 = vmatpush.bf16.msra.mxu0 %v1061_v11  ;;  %336 = vmatpush.bf16.msrb.mxu3 %v1128_v32 }
  0x23   :  { %675 = vmatpush.bf16.msra.mxu1 %v1100_v25 }
  0x24   :  { %380 = vmatpush.bf16.msra.mxu2 %v1038_v3 }
  0x25   :  { %393 = vmatpush.bf16.msra.mxu3 %v1049_v7  ;;  %662 = vmatpush.bf16.msra.mxu0 %v1091_v23 }
  0x27   :  { %676 = vmatpush.bf16.msra.mxu1 %v1128_v32 }
  0x28   :  { %381 = vmatpush.bf16.msra.mxu2 %v1061_v11 }
  0x29   :  { %394 = vmatpush.bf16.msra.mxu3 %v1070_v14  ;;  %663 = vmatpush.bf16.msra.mxu0 %v1120_v30 }
  0x2c   :  { %382 = vmatpush.bf16.msra.mxu2 %v1091_v23 }
  0x2d   :  { %395 = vmatpush.bf16.msra.mxu3 %v1100_v25 }
  0x30   :  { %383 = vmatpush.bf16.msra.mxu2 %v1120_v30 }
  0x31   :  { %396 = vmatpush.bf16.msra.mxu3 %v1128_v32 }
  0x7a   :  { %v288_v62 = vpop.permute.xlu0 %287 }
  0x87   :  { %v138_v41 = vpop.f32.mrf.mxu1 }
  0x88   :  { %v139_v43 = vadd.f32 %v138_v41, %v1171_v38 }
  0x89   :  { %v105_v40 = vpop.f32.mrf.mxu0 }
  0x8a   :  { %v106_v42 = vadd.f32 %v105_v40, %v1169_v37  ;;  %v908_v40 = vld [vmem:[%s1360_s0 + $0x8] sm:$0xff] }
  0x8b   :  { %851 = vmatmul.msk.bf16.gmra.mxu1 %vm80_vm0, %v908_v40  ;;  %846 = vmatmul.msk.bf16.gmra.mxu0 %vm80_vm0, %v908_v40 }
  0x8f   :  { %v140_v12 = vpop.f32.mrf.mxu1 }
  0x90   :  { %v141_v15 = vadd.f32 %v140_v12, %v1171_v38 }
  0x91   :  { %v107_v13 = vpop.f32.mrf.mxu0 }
  0x92   :  { %v108_v16 = vadd.f32 %v107_v13, %v1169_v37 }
  0x96   :  { %v257_v44 = vpop.f32.mrf.mxu2 }
  0x97   :  { %v274_v45 = vadd.f32 %v257_v44, %v106_v42  ;;  %v270_v48 = vpop.f32.mrf.mxu3 }
  0x98   :  { %v275_v49 = vadd.f32 %v270_v48, %v139_v43 }
  0x99   :  { %v276_v50 = vmul.f32 0.5, %v274_v45 }
  0x9a   :  { %v277_v51 = vmul.f32 %v275_v49, %v1180_v47 }
  0x9b   :  { %924 = vtanh.f32 %v276_v50 }
  0x9c   :  { %926 = vtanh.f32 %v277_v51 }
  0x9e   :  { %v259_v52 = vpop.f32.mrf.mxu2 }
  0x9f   :  { %v272_v53 = vpop.f32.mrf.mxu3 }
  0xa1   :  { %v925_v54 = vpop.eup %924 }
  0xa2   :  { %v927_v55 = vpop.eup %926  ;;  %v280_v56 = vmul.f32 0.5, %v925_v54 }
  0xa3   :  { %v281_v57 = vmul.f32 0.5, %v927_v55 }
  0xa4   :  { %v282_v58 = vadd.f32 0.5, %v280_v56 }
  0xa5   :  { %v283_v59 = vadd.f32 0.5, %v281_v57 }
  0xa6   :  { %v290_v63 = vmul.f32 %v288_v62, %v282_v58 }
  0xa7   :  { %v285_v60 = vsel %vm186_vm2, %v927_v55, %v283_v59 }
  0xa8   :  { %v291_v61 = vmul.f32 %v285_v60, %v282_v58 }
  0xaa   :  { %293 = vrot.lane.b32.xlu0 %v291_v61, %s982_s25 }
 0x108   :  { %v143_v50 = vpop.f32.mrf.mxu1  ;;  %v110_v51 = vpop.f32.mrf.mxu0 }
 0x109   :  { %v144_v52 = vadd.f32 %v143_v50, %v1171_v38  ;;  %v111_v53 = vadd.f32 %v110_v51, %v1169_v37 }
 0x11c   :  { %v294_v0 = vpop.permute.xlu0 %293 }
 0x11d   :  { %v296_v1 = vadd.f32 %v294_v0, %v290_v63 }
 0x11f   :  { %928 = vtanh.f32 %v296_v1 }
 0x125   :  { %v929_v2 = vpop.eup %928 }
 0x126   :  { %v298_v4 = vmul.f32 %v929_v2, %v285_v60 }
 0x128   :  { %306 = vrot.lane.b32.xlu1 %v298_v4, %s982_s25 }
 0x130   :  { %301 = vrot.lane.b32.xlu1 %v296_v1, %s982_s25 }
 0x19a   :  { %v307_v5 = vpop.permute.xlu1 %306 }
 0x19b   :  { %v309_v6 = vsel %vm299_vm3, %v307_v5, %v1125_v31 }
 0x19c   :  { %v312_v8 = vpack.c.bf16 %v309_v6, %v309_v6 }
 0x19e   :  { %889 = vmatmul.msk.bf16.vlgmr.msrb.gmra.mxu2 %vm244_vm1, %v312_v8  ;;  %890 = vmatmul.msk.bf16.vlgmr.msrb.gmra.mxu3 %vm244_vm1, %v312_v8 }
 0x19f   :  { %449 = vmatpush.bf16.msrb.mxu3 %v1049_v7  ;;  %436 = vmatpush.bf16.msrb.mxu2 %v1038_v3 }
 0x1a2   :  { %v302_v9 = vpop.permute.xlu1 %301 }
 0x1a3   :  { %v304_v10 = vsel %vm299_vm3, %v302_v9, %v1096_v24  ;;  %450 = vmatpush.bf16.msrb.mxu3 %v1070_v14  ;;  %437 = vmatpush.bf16.msrb.mxu2 %v1061_v11 }
 0x1a4   :  { %355 = vrot.lane.b32.xlu2 %v304_v10, %s982_s25 }
 0x1a7   :  { %451 = vmatpush.bf16.msrb.mxu3 %v1100_v25  ;;  %438 = vmatpush.bf16.msrb.mxu2 %v1091_v23 }
 0x1ab   :  { %452 = vmatpush.bf16.msrb.mxu3 %v1128_v32  ;;  %439 = vmatpush.bf16.msrb.mxu2 %v1120_v30 }
 0x1fe   :  { %v356_v41 = vpop.permute.xlu2 %355 }
 0x221   :  { %v325_v17 = vpop.f32.mrf.mxu2  ;;  %v338_v18 = vpop.f32.mrf.mxu3 }
 0x222   :  { %v342_v19 = vadd.f32 %v325_v17, %v108_v16  ;;  %v343_v20 = vadd.f32 %v338_v18, %v141_v15  ;;  %v145_v17 = vpop.f32.mrf.mxu1  ;;  %v112_v18 = vpop.f32.mrf.mxu0 }
 0x224   :  { %v344_v21 = vmul.f32 0.5, %v342_v19  ;;  %v345_v22 = vmul.f32 %v343_v20, %v1180_v47  ;;  %v146_v19 = vadd.f32 %v145_v17, %v1171_v38  ;;  %v113_v20 = vadd.f32 %v112_v18, %v1169_v37 }
 0x226   :  { %930 = vtanh.f32 %v344_v21 }
 0x227   :  { %932 = vtanh.f32 %v345_v22 }
 0x229   :  { %v327_v24 = vpop.f32.mrf.mxu2  ;;  %v340_v26 = vpop.f32.mrf.mxu3 }
 0x22c   :  { %v931_v27 = vpop.eup %930 }
 0x22d   :  { %v933_v28 = vpop.eup %932  ;;  %v348_v29 = vmul.f32 0.5, %v931_v27 }
 0x22e   :  { %v349_v31 = vmul.f32 0.5, %v933_v28 }
 0x22f   :  { %v350_v33 = vadd.f32 0.5, %v348_v29 }
 0x230   :  { %v351_v34 = vadd.f32 0.5, %v349_v31 }
 0x231   :  { %v358_v42 = vmul.f32 %v356_v41, %v350_v33 }
 0x232   :  { %v353_v35 = vsel %vm186_vm2, %v933_v28, %v351_v34 }
 0x233   :  { %v359_v36 = vmul.f32 %v353_v35, %v350_v33 }
 0x235   :  { %361 = vrot.lane.b32.xlu2 %v359_v36, %s982_s25 }
 0x28f   :  { %v362_v43 = vpop.permute.xlu2 %361 }
 0x290   :  { %v364_v44 = vadd.f32 %v362_v43, %v358_v42 }
 0x292   :  { %934 = vtanh.f32 %v364_v44 }
 0x298   :  { %v935_v45 = vpop.eup %934 }
 0x299   :  { %v366_v46 = vmul.f32 %v935_v45, %v353_v35 }
 0x29b   :  { %v369_v48 = vpack.c.bf16 %v366_v46, %v366_v46 }
 0x29d   :  { %371 = vrot.lane.b32.xlu0 %v369_v48, %s982_s25 }
 0x30f   :  { %v372_v49 = vpop.permute.xlu0 %371 }
 0x310   :  { %891 = vmatmul.msk.bf16.vlgmr.msra.gmra.mxu2 %vm244_vm1, %v372_v49  ;;  %892 = vmatmul.msk.bf16.vlgmr.msra.gmra.mxu3 %vm244_vm1, %v372_v49 }
 0x311   :  { %505 = vmatpush.bf16.msra.mxu3 %v1049_v7  ;;  %492 = vmatpush.bf16.msra.mxu2 %v1038_v3 }
 0x315   :  { %506 = vmatpush.bf16.msra.mxu3 %v1070_v14  ;;  %493 = vmatpush.bf16.msra.mxu2 %v1061_v11 }
 0x319   :  { %507 = vmatpush.bf16.msra.mxu3 %v1100_v25  ;;  %494 = vmatpush.bf16.msra.mxu2 %v1091_v23 }
 0x31d   :  { %508 = vmatpush.bf16.msra.mxu3 %v1128_v32  ;;  %495 = vmatpush.bf16.msra.mxu2 %v1120_v30 }
 0x393   :  { %v385_v54 = vpop.f32.mrf.mxu2  ;;  %v398_v55 = vpop.f32.mrf.mxu3 }
 0x394   :  { %v402_v56 = vadd.f32 %v385_v54, %v111_v53  ;;  %v403_v57 = vadd.f32 %v398_v55, %v144_v52 }
 0x396   :  { %v404_v58 = vmul.f32 0.5, %v402_v56  ;;  %v405_v59 = vmul.f32 %v403_v57, %v1180_v47 }
 0x398   :  { %936 = vtanh.f32 %v404_v58 }
 0x399   :  { %938 = vtanh.f32 %v405_v59 }
 0x39b   :  { %v387_v60 = vpop.f32.mrf.mxu2  ;;  %v400_v61 = vpop.f32.mrf.mxu3 }
 0x39e   :  { %v937_v62 = vpop.eup %936 }
 0x39f   :  { %v939_v63 = vpop.eup %938  ;;  %v408_v0 = vmul.f32 0.5, %v937_v62 }
 0x3a0   :  { %v409_v1 = vmul.f32 0.5, %v939_v63 }
 0x3a1   :  { %v410_v2 = vadd.f32 0.5, %v408_v0 }
 0x3a2   :  { %v411_v4 = vadd.f32 0.5, %v409_v1  ;;  %v910_v1 = vld [vmem:[%s1360_s0 + $0x18] sm:$0xff] }
 0x3a3   :  { %v414_v8 = vmul.f32 %v410_v2, %v364_v44  ;;  %v909_v44 = vld [vmem:[%s1360_s0 + $0x10] sm:$0xff] }
 0x3a4   :  { %v413_v5 = vsel %vm186_vm2, %v939_v63, %v411_v4  ;;  %852 = vmatmul.msk.bf16.gmra.mxu1 %vm80_vm0, %v909_v44  ;;  %847 = vmatmul.msk.bf16.gmra.mxu0 %vm80_vm0, %v909_v44 }
 0x3a5   :  { %v415_v6 = vmul.f32 %v413_v5, %v410_v2  ;;  %v38_v2 = vld [vmem:[%s1360_s0 + $0x20] sm:$0xf] }
 0x3a6   :  { %v64_v4 = vunpack.c.l.b16 %v38_v2 }
 0x3a7   :  { %417 = vrot.lane.b32.xlu1 %v415_v6, %s982_s25 }
 0x3b4   :  { %853 = vmatmul.msk.bf16.gmra.mxu1 %vm80_vm0, %v910_v1  ;;  %848 = vmatmul.msk.bf16.gmra.mxu0 %vm80_vm0, %v910_v1 }
 0x419   :  { %v418_v9 = vpop.permute.xlu1 %417 }
 0x41a   :  { %v420_v10 = vadd.f32 %v418_v9, %v414_v8 }
 0x41c   :  { %940 = vtanh.f32 %v420_v10 }
 0x421   :  { %v148_v53 = vpop.f32.mrf.mxu1  ;;  %v115_v54 = vpop.f32.mrf.mxu0 }
 0x422   :  { %v941_v12 = vpop.eup %940  ;;  %v149_v55 = vadd.f32 %v148_v53, %v1171_v38 }
 0x423   :  { %v422_v13 = vmul.f32 %v941_v12, %v413_v5  ;;  %v69_v5 = vpack.c.b16 %v64_v4, %v64_v4 }
 0x425   :  { %v425_v15 = vpack.c.bf16 %v422_v13, %v422_v13  ;;  %854 = vmatmul.msk.bf16.gmra.mxu1 %vm80_vm0, %v69_v5  ;;  %849 = vmatmul.msk.bf16.gmra.mxu0 %vm80_vm0, %v69_v5 }
 0x427   :  { %427 = vrot.lane.b32.xlu2 %v425_v15, %s982_s25 }
 0x429   :  { %v150_v15 = vpop.f32.mrf.mxu1 }
 0x431   :  { %v153_v17 = vpop.f32.mrf.mxu1 }
 0x481   :  { %v428_v16 = vpop.permute.xlu2 %427 }
 0x482   :  { %893 = vmatmul.msk.bf16.vlgmr.msrb.gmra.mxu2 %vm244_vm1, %v428_v16  ;;  %894 = vmatmul.msk.bf16.vlgmr.msrb.gmra.mxu3 %vm244_vm1, %v428_v16  ;;  %v117_v16 = vpop.f32.mrf.mxu0 }
 0x483   :  { %617 = vmatpush.bf16.msrb.mxu3 %v1049_v7  ;;  %604 = vmatpush.bf16.msrb.mxu2 %v1038_v3 }
 0x487   :  { %618 = vmatpush.bf16.msrb.mxu3 %v1070_v14  ;;  %605 = vmatpush.bf16.msrb.mxu2 %v1061_v11 }
 0x48a   :  { %v120_v18 = vpop.f32.mrf.mxu0 }
 0x48b   :  { %619 = vmatpush.bf16.msrb.mxu3 %v1100_v25  ;;  %606 = vmatpush.bf16.msrb.mxu2 %v1091_v23 }
 0x48f   :  { %620 = vmatpush.bf16.msrb.mxu3 %v1128_v32  ;;  %607 = vmatpush.bf16.msrb.mxu2 %v1120_v30 }
 0x505   :  { %v441_v21 = vpop.f32.mrf.mxu2  ;;  %v454_v22 = vpop.f32.mrf.mxu3 }
 0x506   :  { %v458_v24 = vadd.f32 %v441_v21, %v113_v20  ;;  %v459_v26 = vadd.f32 %v454_v22, %v146_v19  ;;  %v1279_v19 = vpop.f32.mrf.mxu1  ;;  %v1281_v20 = vpop.f32.mrf.mxu0 }
 0x508   :  { %v460_v27 = vmul.f32 0.5, %v458_v24  ;;  %v461_v28 = vmul.f32 %v459_v26, %v1180_v47 }
 0x50a   :  { %942 = vtanh.f32 %v460_v27 }
 0x50b   :  { %944 = vtanh.f32 %v461_v28  ;;  %v151_v28 = vadd.f32 %v150_v15, %v1171_v38 }
 0x50d   :  { %v443_v29 = vpop.f32.mrf.mxu2  ;;  %v456_v31 = vpop.f32.mrf.mxu3 }
 0x50e   :  { %v1283_v21 = vpop.f32.mrf.mxu1  ;;  %v1285_v22 = vpop.f32.mrf.mxu0  ;;  %v118_v29 = vadd.f32 %v117_v16, %v1169_v37  ;;  %v156_v16 = vadd.f32 %v1279_v19, %v1171_v38 }
 0x510   :  { %v943_v33 = vpop.eup %942 }
 0x511   :  { %v945_v34 = vpop.eup %944  ;;  %v464_v35 = vmul.f32 0.5, %v943_v33 }
 0x512   :  { %v465_v36 = vmul.f32 0.5, %v945_v34 }
 0x513   :  { %v466_v40 = vadd.f32 0.5, %v464_v35 }
 0x514   :  { %v467_v41 = vadd.f32 0.5, %v465_v36 }
 0x515   :  { %v470_v45 = vmul.f32 %v466_v40, %v420_v10 }
 0x516   :  { %v469_v42 = vsel %vm186_vm2, %v945_v34, %v467_v41  ;;  %v160_v26 = vpop.f32.mrf.mxu1  ;;  %v127_v27 = vpop.f32.mrf.mxu0 }
 0x517   :  { %v471_v43 = vmul.f32 %v469_v42, %v466_v40 }
 0x519   :  { %473 = vrot.lane.b32.xlu0 %v471_v43, %s982_s25 }
 0x58b   :  { %v474_v46 = vpop.permute.xlu0 %473 }
 0x58c   :  { %v476_v48 = vadd.f32 %v474_v46, %v470_v45 }
 0x58e   :  { %946 = vtanh.f32 %v476_v48 }
 0x594   :  { %v947_v49 = vpop.eup %946 }
 0x595   :  { %v478_v50 = vmul.f32 %v947_v49, %v469_v42 }
 0x597   :  { %v481_v51 = vpack.c.bf16 %v478_v50, %v478_v50 }
 0x599   :  { %483 = vrot.lane.b32.xlu1 %v481_v51, %s982_s25 }
 0x60b   :  { %v484_v52 = vpop.permute.xlu1 %483 }
 0x60c   :  { %895 = vmatmul.msk.bf16.vlgmr.msra.gmra.mxu2 %vm244_vm1, %v484_v52  ;;  %896 = vmatmul.msk.bf16.vlgmr.msra.gmra.mxu3 %vm244_vm1, %v484_v52 }
 0x60d   :  { %729 = vmatpush.bf16.msra.mxu3 %v1049_v7  ;;  %716 = vmatpush.bf16.msra.mxu2 %v1038_v3  ;;  %v116_v7 = vadd.f32 %v115_v54, %v1169_v37 }
 0x611   :  { %730 = vmatpush.bf16.msra.mxu3 %v1070_v14  ;;  %717 = vmatpush.bf16.msra.mxu2 %v1061_v11 }
 0x615   :  { %731 = vmatpush.bf16.msra.mxu3 %v1100_v25  ;;  %718 = vmatpush.bf16.msra.mxu2 %v1091_v23 }
 0x619   :  { %732 = vmatpush.bf16.msra.mxu3 %v1128_v32  ;;  %719 = vmatpush.bf16.msra.mxu2 %v1120_v30 }
 0x68f   :  { %v497_v56 = vpop.f32.mrf.mxu2  ;;  %v510_v3 = vpop.f32.mrf.mxu3 }
 0x690   :  { %v514_v57 = vadd.f32 %v497_v56, %v116_v7  ;;  %v515_v14 = vadd.f32 %v510_v3, %v149_v55 }
 0x692   :  { %v516_v58 = vmul.f32 0.5, %v514_v57  ;;  %v517_v11 = vmul.f32 %v515_v14, %v1180_v47  ;;  %v154_v57 = vadd.f32 %v153_v17, %v1171_v38  ;;  %v121_v14 = vadd.f32 %v120_v18, %v1169_v37 }
 0x693   :  { %v123_v17 = vadd.f32 %v1281_v20, %v1169_v37 }
 0x694   :  { %948 = vtanh.f32 %v516_v58 }
 0x695   :  { %950 = vtanh.f32 %v517_v11 }
 0x697   :  { %v499_v23 = vpop.f32.mrf.mxu2  ;;  %v512_v25 = vpop.f32.mrf.mxu3 }
 0x69a   :  { %v949_v32 = vpop.eup %948 }
 0x69b   :  { %v951_v59 = vpop.eup %950  ;;  %v520_v30 = vmul.f32 0.5, %v949_v32 }
 0x69c   :  { %v521_v60 = vmul.f32 0.5, %v951_v59 }
 0x69d   :  { %v522_v61 = vadd.f32 0.5, %v520_v30 }
 0x69e   :  { %v523_v62 = vadd.f32 0.5, %v521_v60 }
 0x69f   :  { %v526_v6 = vmul.f32 %v522_v61, %v476_v48 }
 0x6a0   :  { %v525_v63 = vsel %vm186_vm2, %v951_v59, %v523_v62 }
 0x6a1   :  { %v527_v0 = vmul.f32 %v525_v63, %v522_v61 }
 0x6a3   :  { %529 = vrot.lane.b32.xlu2 %v527_v0, %s982_s25 }
 0x6fd   :  { %v530_v8 = vpop.permute.xlu2 %529 }
 0x6fe   :  { %v532_v9 = vadd.f32 %v530_v8, %v526_v6 }
 0x700   :  { %952 = vtanh.f32 %v532_v9 }
 0x706   :  { %v953_v10 = vpop.eup %952 }
 0x707   :  { %v534_v12 = vmul.f32 %v953_v10, %v525_v63 }
 0x709   :  { %v537_v13 = vpack.c.bf16 %v534_v12, %v534_v12 }
 0x70b   :  { %539 = vrot.lane.b32.xlu0 %v537_v13, %s982_s25 }
 0x77d   :  { %v540_v24 = vpop.permute.xlu0 %539 }
 0x77e   :  { %897 = vmatmul.msk.bf16.vlgmr.msrb.gmra.mxu0 %vm244_vm1, %v540_v24  ;;  %898 = vmatmul.msk.bf16.vlgmr.msrb.gmra.mxu1 %vm244_vm1, %v540_v24 }
 0x7fb   :  { %v553_v31 = vpop.f32.mrf.mxu0  ;;  %v566_v33 = vpop.f32.mrf.mxu1 }
 0x7fc   :  { %v570_v34 = vadd.f32 %v553_v31, %v118_v29  ;;  %v571_v35 = vadd.f32 %v566_v33, %v151_v28 }
 0x7fe   :  { %v572_v36 = vmul.f32 0.5, %v570_v34  ;;  %v573_v40 = vmul.f32 %v571_v35, %v1180_v47 }
 0x800   :  { %954 = vtanh.f32 %v572_v36 }
 0x801   :  { %956 = vtanh.f32 %v573_v40 }
 0x803   :  { %v555_v41 = vpop.f32.mrf.mxu0  ;;  %v568_v42 = vpop.f32.mrf.mxu1 }
 0x806   :  { %v955_v43 = vpop.eup %954 }
 0x807   :  { %v957_v44 = vpop.eup %956  ;;  %v576_v45 = vmul.f32 0.5, %v955_v43 }
 0x808   :  { %v577_v46 = vmul.f32 0.5, %v957_v44 }
 0x809   :  { %v578_v48 = vadd.f32 0.5, %v576_v45 }
 0x80a   :  { %v579_v49 = vadd.f32 0.5, %v577_v46 }
 0x80b   :  { %v582_v52 = vmul.f32 %v578_v48, %v532_v9 }
 0x80c   :  { %v581_v50 = vsel %vm186_vm2, %v957_v44, %v579_v49 }
 0x80d   :  { %v583_v51 = vmul.f32 %v581_v50, %v578_v48 }
 0x80f   :  { %585 = vrot.lane.b32.xlu1 %v583_v51, %s982_s25  ;;  %v159_v51 = vadd.f32 %v1283_v21, %v1171_v38 }
 0x881   :  { %v586_v53 = vpop.permute.xlu1 %585 }
 0x882   :  { %v588_v54 = vadd.f32 %v586_v53, %v582_v52  ;;  %v126_v52 = vadd.f32 %v1285_v22, %v1169_v37  ;;  %v765_v22 = vld [vmem:[%s1365_s6 + $0x30] sm:$0xff] }
 0x884   :  { %958 = vtanh.f32 %v588_v54 }
 0x88a   :  { %v959_v55 = vpop.eup %958 }
 0x88b   :  { %v590_v7 = vmul.f32 %v959_v55, %v581_v50 }
 0x88d   :  { %v593_v56 = vpack.c.bf16 %v590_v7, %v590_v7 }
 0x88f   :  { %595 = vrot.lane.b32.xlu2 %v593_v56, %s982_s25 }
 0x8e9   :  { %v596_v3 = vpop.permute.xlu2 %595 }
 0x8ea   :  { %899 = vmatmul.msk.bf16.vlgmr.msrb.gmra.mxu2 %vm244_vm1, %v596_v3  ;;  %900 = vmatmul.msk.bf16.vlgmr.msrb.gmra.mxu3 %vm244_vm1, %v596_v3 }
 0x96d   :  { %v609_v58 = vpop.f32.mrf.mxu2  ;;  %v622_v11 = vpop.f32.mrf.mxu3 }
 0x96e   :  { %v626_v23 = vadd.f32 %v609_v58, %v121_v14  ;;  %v627_v25 = vadd.f32 %v622_v11, %v154_v57 }
 0x970   :  { %v628_v32 = vmul.f32 0.5, %v626_v23  ;;  %v629_v59 = vmul.f32 %v627_v25, %v1180_v47 }
 0x972   :  { %960 = vtanh.f32 %v628_v32 }
 0x973   :  { %962 = vtanh.f32 %v629_v59  ;;  %v764_v59 = vld [vmem:[%s1365_s6 + $0x28] sm:$0xff] }
 0x975   :  { %v611_v30 = vpop.f32.mrf.mxu2  ;;  %v624_v60 = vpop.f32.mrf.mxu3 }
 0x976   :  { %v762_v30 = vld [vmem:[%s1365_s6 + $0x18] sm:$0xff]  ;;  %v761_v60 = vld [vmem:[%s1365_s6 + $0x10] sm:$0xff] }
 0x978   :  { %v961_v61 = vpop.eup %960 }
 0x979   :  { %v963_v62 = vpop.eup %962  ;;  %v632_v63 = vmul.f32 0.5, %v961_v61  ;;  %v760_v61 = vld [vmem:[%s1365_s6 + $0x8] sm:$0xff] }
 0x97a   :  { %v633_v0 = vmul.f32 0.5, %v963_v62 }
 0x97b   :  { %v634_v1 = vadd.f32 0.5, %v632_v63 }
 0x97c   :  { %v635_v2 = vadd.f32 0.5, %v633_v0 }
 0x97d   :  { %v638_v6 = vmul.f32 %v634_v1, %v588_v54 }
 0x97e   :  { %v637_v4 = vsel %vm186_vm2, %v963_v62, %v635_v2  ;;  %v759_v62 = vld [vmem:[%s1365_s6] sm:$0xff] }
 0x97f   :  { %v639_v5 = vmul.f32 %v637_v4, %v634_v1 }
 0x981   :  { %641 = vrot.lane.b32.xlu0 %v639_v5, %s982_s25 }
 0x9f3   :  { %v642_v8 = vpop.permute.xlu0 %641 }
 0x9f4   :  { %v644_v9 = vadd.f32 %v642_v8, %v638_v6  ;;  %v923_v6 = vld [vmem:[%s1364_s7] ss:$0 sm:$0xff] }
 0x9f6   :  { %964 = vtanh.f32 %v644_v9 }
 0x9fc   :  { %v965_v10 = vpop.eup %964 }
 0x9fd   :  { %v646_v12 = vmul.f32 %v965_v10, %v637_v4 }
 0x9ff   :  { %v649_v13 = vpack.c.bf16 %v646_v12, %v646_v12 }
 0xa01   :  { %651 = vrot.lane.b32.xlu1 %v649_v13, %s982_s25 }
 0xa73   :  { %v652_v15 = vpop.permute.xlu1 %651 }
 0xa74   :  { %901 = vmatmul.msk.bf16.vlgmr.msra.gmra.mxu0 %vm244_vm1, %v652_v15  ;;  %902 = vmatmul.msk.bf16.vlgmr.msra.gmra.mxu1 %vm244_vm1, %v652_v15 }
 0xaf1   :  { %v665_v18 = vpop.f32.mrf.mxu0  ;;  %v678_v24 = vpop.f32.mrf.mxu1 }
 0xaf2   :  { %v682_v26 = vadd.f32 %v665_v18, %v123_v17  ;;  %v683_v27 = vadd.f32 %v678_v24, %v156_v16 }
 0xaf4   :  { %v684_v28 = vmul.f32 0.5, %v682_v26  ;;  %v685_v29 = vmul.f32 %v683_v27, %v1180_v47 }
 0xaf6   :  { %966 = vtanh.f32 %v684_v28 }
 0xaf7   :  { %968 = vtanh.f32 %v685_v29 }
 0xaf9   :  { %v667_v31 = vpop.f32.mrf.mxu0  ;;  %v680_v33 = vpop.f32.mrf.mxu1 }
 0xafc   :  { %v967_v34 = vpop.eup %966 }
 0xafd   :  { %v969_v35 = vpop.eup %968  ;;  %v688_v36 = vmul.f32 0.5, %v967_v34 }
 0xafe   :  { %v689_v40 = vmul.f32 0.5, %v969_v35 }
 0xaff   :  { %v690_v41 = vadd.f32 0.5, %v688_v36 }
 0xb00   :  { %v691_v19 = vadd.f32 0.5, %v689_v40 }
 0xb01   :  { %v694_v43 = vmul.f32 %v690_v41, %v644_v9 }
 0xb02   :  { %v693_v20 = vsel %vm186_vm2, %v969_v35, %v691_v19 }
 0xb03   :  { %v695_v42 = vmul.f32 %v693_v20, %v690_v41 }
 0xb05   :  { %697 = vrot.lane.b32.xlu2 %v695_v42, %s982_s25 }
 0xb5f   :  { %v698_v44 = vpop.permute.xlu2 %697 }
 0xb60   :  { %v700_v45 = vadd.f32 %v698_v44, %v694_v43 }
 0xb62   :  { %970 = vtanh.f32 %v700_v45 }
 0xb68   :  { %v971_v46 = vpop.eup %970 }
 0xb69   :  { %v702_v48 = vmul.f32 %v971_v46, %v693_v20 }
 0xb6b   :  { %v705_v49 = vpack.c.bf16 %v702_v48, %v702_v48 }
 0xb6d   :  { %707 = vrot.lane.b32.xlu0 %v705_v49, %s982_s25 }
 0xbdf   :  { %v708_v50 = vpop.permute.xlu0 %707 }
 0xbe0   :  { %903 = vmatmul.msk.bf16.vlgmr.msra.gmra.mxu2 %vm244_vm1, %v708_v50  ;;  %904 = vmatmul.msk.bf16.vlgmr.msra.gmra.mxu3 %vm244_vm1, %v708_v50 }
 0xc63   :  { %v721_v53 = vpop.f32.mrf.mxu2  ;;  %v734_v54 = vpop.f32.mrf.mxu3 }
 0xc64   :  { %v738_v55 = vadd.f32 %v721_v53, %v126_v52  ;;  %v739_v7 = vadd.f32 %v734_v54, %v159_v51 }
 0xc66   :  { %v740_v56 = vmul.f32 0.5, %v738_v55  ;;  %v741_v3 = vmul.f32 %v739_v7, %v1180_v47  ;;  %v766_v47 = vld [vmem:[%s1365_s6 + $0x38] sm:$0xff] }
 0xc67   :  { %784 = vmatpush.msrb.mxu0 %v766_v47 }
 0xc68   :  { %972 = vtanh.f32 %v740_v56 }
 0xc69   :  { %974 = vtanh.f32 %v741_v3  ;;  %785 = vmatpush.msrb.mxu0 %v765_v22 }
 0xc6b   :  { %v723_v57 = vpop.f32.mrf.mxu2  ;;  %v736_v14 = vpop.f32.mrf.mxu3  ;;  %786 = vmatpush.msrb.mxu0 %v764_v59 }
 0xc6d   :  { %787 = vmatpush.msrb.mxu0 %v763_v39 }
 0xc6e   :  { %v973_v58 = vpop.eup %972 }
 0xc6f   :  { %v975_v11 = vpop.eup %974  ;;  %v744_v23 = vmul.f32 0.5, %v973_v58  ;;  %788 = vmatpush.msrb.mxu0 %v762_v30 }
 0xc70   :  { %v745_v25 = vmul.f32 0.5, %v975_v11 }
 0xc71   :  { %v746_v32 = vadd.f32 0.5, %v744_v23  ;;  %789 = vmatpush.msrb.mxu0 %v761_v60 }
 0xc72   :  { %v747_v38 = vadd.f32 0.5, %v745_v25 }
 0xc73   :  { %790 = vmatpush.msrb.mxu0 %v760_v61  ;;  %v750_v63 = vmul.f32 %v746_v32, %v700_v45 }
 0xc74   :  { %v749_v37 = vsel %vm186_vm2, %v975_v11, %v747_v38 }
 0xc75   :  { %v751_v21 = vmul.f32 %v749_v37, %v746_v32  ;;  %791 = vmatpush.msrb.mxu0 %v759_v62 }
 0xc77   :  { %753 = vrot.lane.b32.xlu1 %v751_v21, %s982_s25 }
 0xce9   :  { %v754_v0 = vpop.permute.xlu1 %753 }
 0xcea   :  { %v756_v1 = vadd.f32 %v754_v0, %v750_v63 }
 0xcec   :  { %976 = vtanh.f32 %v756_v1 }
 0xcf2   :  { %v977_v2 = vpop.eup %976 }
 0xcf3   :  { %v758_v4 = vmul.f32 %v977_v2, %v749_v37 }
 0xcf5   :  { %772 = vrot.lane.b32.xlu2 %v758_v4, %s982_s25 }
 0xd4f   :  { %v773_v5 = vpop.permute.xlu2 %772 }
 0xd50   :  { %905 = vmatmul.msk.f32.vlgmr.msrb.gmra.mxu0 %vm244_vm1, %v773_v5 }
 0xdcd   :  { %v793_v8 = vpop.f32.mrf.mxu0 }
 0xdce   :  { %v794_v9 = vadd.f32 %v923_v6, %v793_v8 }
 0xdd0   :  { %v906_v10 = vmul.f32 -1.442695, %v794_v9 }
 0xdd2   :  { %978 = vpow2.f32 %v906_v10 }
 0xdd8   :  { %v979_v12 = vpop.eup %978 }
 0xdd9   :  { %v799_v13 = vadd.f32 1.0, %v979_v12 }
 0xddb   :  { %980 = vrcp.f32 %v799_v13  ;;  %v811_v18 = vand.u32 2147483648, %v799_v13  ;;  %v809_v26 = vand.u32 2147483647, %v799_v13  ;;  %vm805_vm5 = vweird.f32 %v799_v13 }
 0xddd   :  { %v812_v28 = vor.u32 1.1754944e-38, %v811_v18  ;;  %vm810_vm8 = vcmp.eq.f32.partialorder %v809_v26, 8.507059e+37 }
 0xde1   :  { %v981_v15 = vpop.eup %980 }
 0xde2   :  { %v801_v16 = vmul.f32 %v981_v15, %v799_v13  ;;  %vm806_vm4 = vweird.f32 %v981_v15 }
 0xde3   :  { %vm807_vm6 = vmor %vm805_vm5, %vm806_vm4 }
 0xde4   :  { %v802_v17 = vsub.f32 1.0, %v801_v16 }
 0xde6   :  { %v803_v24 = vmul.f32 %v981_v15, %v802_v17 }
 0xde8   :  { %v804_v27 = vadd.f32 %v981_v15, %v803_v24 }
 0xdea   :  { %v808_v29 = vsel %vm807_vm6, %v981_v15, %v804_v27 }
 0xdeb   :  { %v813_v31 = vsel %vm810_vm8, %v812_v28, %v808_v29 }
 0xdec   :  { %816 = vst.msk [vmem:[%s1366_s8] sm:$0xff] %vm815_vm7, %v813_v31 }

</bundles_post_ra>
